<compile_context>
chip_gen: v5e
topology: v5e:2x2
jax: 0.10.0
libtpu: 0.0.40
codegen_flags: <defaults>
</compile_context>

<pallas_src>
import math
import jax
import jax.numpy as jnp
from jax import lax
from jax.experimental import pallas as pl
from jax.experimental.pallas import tpu as pltpu


def _ffn_geglu_kernel(x_ref, wa_ref, ba_ref, wg_ref, bg_ref, w2_ref, b2_ref,
                      o_ref, acc_ref):
    # x_ref  : (TM, D)   row tile of the flattened input (resident across k)
    # wa_ref : (D, TI)   value half of the first projection weight
    # ba_ref : (1, TI)
    # wg_ref : (D, TI)   gate half of the first projection weight
    # bg_ref : (1, TI)
    # w2_ref : (TI, D)   slab of the second projection weight (reduction over I)
    # b2_ref : (1, D)
    # o_ref  : (TM, D)   output row tile (resident across the I axis)
    # acc_ref: (TM, D)   f32 accumulator scratch
    k = pl.program_id(1)

    @pl.when(k == 0)
    def _():
        acc_ref[...] = jnp.zeros_like(acc_ref)

    x = x_ref[...]

    # First projection, split into value / gate halves. Operands stay in their
    # native dtype; the MXU accumulates in f32.
    a = jnp.dot(x, wa_ref[...], preferred_element_type=jnp.float32)
    a = a + ba_ref[...].astype(jnp.float32)
    g = jnp.dot(x, wg_ref[...], preferred_element_type=jnp.float32)
    g = g + bg_ref[...].astype(jnp.float32)

    # Exact (erf-based) GELU gating in f32, matching torch F.gelu default.
    inv_sqrt2 = jnp.float32(1.0 / math.sqrt(2.0))
    y = a * (0.5 * g * (1.0 + lax.erf(g * inv_sqrt2)))

    # Dropout(p=0.0) is the identity -> nothing to do.

    # Second projection: accumulate partial products over the inner dimension.
    acc_ref[...] += jnp.dot(y.astype(w2_ref.dtype), w2_ref[...],
                            preferred_element_type=jnp.float32)

    # Epilogue: add the output bias exactly once and write back.
    @pl.when(k == pl.num_programs(1) - 1)
    def _():
        o_ref[...] = (acc_ref[...] + b2_ref[...].astype(jnp.float32)
                      ).astype(o_ref.dtype)


def _round_up(x, m):
    return ((x + m - 1) // m) * m


def _candidate_inner_tiles(inner):
    """Divisors of `inner` that are multiples of 128 (plus `inner` itself),
    descending."""
    cands = {inner}
    for t in range(128, inner, 128):
        if inner % t == 0:
            cands.add(t)
    return sorted(cands, reverse=True)


def _vmem_usage(tm, ti, hidden, in_bytes, out_bytes):
    """Rough double-buffered VMEM footprint for one grid step."""
    x_b = 2 * tm * hidden * in_bytes              # x tile (double-buffered)
    w1_b = 2 * 2 * hidden * ti * in_bytes         # value + gate halves
    w2_b = 2 * ti * hidden * in_bytes             # w2 slab
    bias_b = 2 * (2 * ti + hidden) * in_bytes     # b1 halves + b2
    out_b = 2 * tm * hidden * out_bytes           # output tile
    acc_b = tm * hidden * 4                       # f32 scratch (single)
    return x_b + w1_b + w2_b + bias_b + out_b + acc_b


def _choose_tiles(M, hidden, inner, in_bytes, out_bytes,
                  vmem_budget=48 * 1024 * 1024):
    """Pick (tm, ti): row tile capped at 256, inner tile as large as fits."""
    tm = min(256, _round_up(M, 8))
    cands = _candidate_inner_tiles(inner)
    while True:
        for ti in cands:
            if _vmem_usage(tm, ti, hidden, in_bytes, out_bytes) <= vmem_budget:
                return tm, ti
        if tm <= 8:
            # Last resort: smallest tiles even if over budget (tiny models).
            return tm, cands[-1]
        tm = max(8, tm // 2)


def feedforward_geglu(x, w1, b1, w2, b2, *, tm=None, ti=None):
    """x: (..., hidden). w1: (hidden, 2*inner), b1: (2*inner,),
       w2: (inner, hidden), b2: (hidden,).  Weights stored transposed
       (w = W_torch.T) so y = x @ w + b."""
    orig_shape = x.shape
    hidden = orig_shape[-1]
    inner = w2.shape[0]
    assert w1.shape == (hidden, 2 * inner)
    assert b1.shape == (2 * inner,)
    assert w2.shape == (inner, hidden)
    assert b2.shape == (hidden,)

    # Split first projection into value ('a') / gate ('g') halves so the kernel
    # never lane-slices a (TM, 2*I) intermediate.
    wa, wg = w1[:, :inner], w1[:, inner:]
    ba, bg = b1[:inner].reshape(1, inner), b1[inner:].reshape(1, inner)
    b2_2d = b2.reshape(1, hidden)

    x2d = x.reshape(-1, hidden)
    M = x2d.shape[0]

    in_bytes = jnp.dtype(x.dtype).itemsize
    out_bytes = in_bytes
    auto_tm, auto_ti = _choose_tiles(M, hidden, inner, in_bytes, out_bytes)
    if tm is None:
        tm = auto_tm
    if ti is None:
        ti = auto_ti
    assert inner % ti == 0, "inner dim must be divisible by the inner tile"

    # Pad ragged M up to the row tile.
    M_pad = _round_up(M, tm)
    if M_pad != M:
        x2d = jnp.pad(x2d, ((0, M_pad - M), (0, 0)))

    grid = (M_pad // tm, inner // ti)   # reduction axis last

    # Advisory cost hint for XLA scheduling around the kernel.
    flops = 6 * M_pad * hidden * inner          # 2*M*D*2I (proj) + 2*M*I*D (out)
    bytes_accessed = int(
        x2d.size * x2d.dtype.itemsize
        + w1.size * w1.dtype.itemsize + b1.size * b1.dtype.itemsize
        + w2.size * w2.dtype.itemsize + b2.size * b2.dtype.itemsize
        + M_pad * hidden * x.dtype.itemsize)
    cost = pl.CostEstimate(flops=flops, transcendentals=M_pad * inner,
                           bytes_accessed=bytes_accessed)

    out = pl.pallas_call(
        _ffn_geglu_kernel,
        out_shape=jax.ShapeDtypeStruct((M_pad, hidden), x.dtype),
        grid_spec=pltpu.PrefetchScalarGridSpec(
            num_scalar_prefetch=0,
            grid=grid,
            in_specs=[
                pl.BlockSpec((tm, hidden), lambda i, k: (i, 0)),   # x rows
                pl.BlockSpec((hidden, ti), lambda i, k: (0, k)),   # w1 value half
                pl.BlockSpec((1, ti),      lambda i, k: (0, k)),   # b1 value half
                pl.BlockSpec((hidden, ti), lambda i, k: (0, k)),   # w1 gate half
                pl.BlockSpec((1, ti),      lambda i, k: (0, k)),   # b1 gate half
                pl.BlockSpec((ti, hidden), lambda i, k: (k, 0)),   # w2 slab
                pl.BlockSpec((1, hidden),  lambda i, k: (0, 0)),   # b2
            ],
            out_specs=pl.BlockSpec((tm, hidden), lambda i, k: (i, 0)),
            scratch_shapes=[pltpu.VMEM((tm, hidden), jnp.float32)],
        ),
        compiler_params=pltpu.CompilerParams(
            dimension_semantics=("parallel", "arbitrary"),
            vmem_limit_bytes=64 * 1024 * 1024,
        ),
        cost_estimate=cost,
    )(x2d, wa, ba, wg, bg, w2, b2_2d)

    if M_pad != M:
        out = out[:M]
    return out.reshape(orig_shape)


def init_params(key, hidden_dim, mult=4, dtype=jnp.float32):
    """Deterministic init mimicking torch.nn.Linear (uniform +/-1/sqrt(fan_in)).
    Weights stored already transposed: w = W_torch.T so y = x @ w + b."""
    inner = mult * hidden_dim
    k1, k2, k3, k4 = jax.random.split(key, 4)

    bound1 = 1.0 / math.sqrt(hidden_dim)
    w1 = jax.random.uniform(k1, (hidden_dim, 2 * inner), dtype,
                            minval=-bound1, maxval=bound1)
    b1 = jax.random.uniform(k2, (2 * inner,), dtype,
                            minval=-bound1, maxval=bound1)

    bound2 = 1.0 / math.sqrt(inner)
    w2 = jax.random.uniform(k3, (inner, hidden_dim), dtype,
                            minval=-bound2, maxval=bound2)
    b2 = jax.random.uniform(k4, (hidden_dim,), dtype,
                            minval=-bound2, maxval=bound2)
    return w1, b1, w2, b2


def _reference(x, w1, b1, w2, b2):
    h = x @ w1 + b1
    a, g = jnp.split(h, 2, axis=-1)
    y = a * jax.nn.gelu(g, approximate=False)
    return y @ w2 + b2


if __name__ == "__main__":
    batch, seq, hidden = 2, 8, 32
    mult = 4

    key = jax.random.PRNGKey(0)
    kx, kp = jax.random.split(key)
    x = jax.random.normal(kx, (batch, seq, hidden), jnp.float32)
    w1, b1, w2, b2 = init_params(kp, hidden, mult)

    out = feedforward_geglu(x, w1, b1, w2, b2)
    out = jax.block_until_ready(out)

    ref = _reference(x, w1, b1, w2, b2)
    assert out.shape == x.shape
    assert jnp.allclose(out, ref, atol=1e-4, rtol=1e-4)

    # Ragged row-count path (exercises padding of M up to the row tile).
    x_ragged = jax.random.normal(kx, (1, 5, hidden), jnp.float32)
    out_r = jax.block_until_ready(feedforward_geglu(x_ragged, w1, b1, w2, b2))
    ref_r = _reference(x_ragged, w1, b1, w2, b2)
    assert out_r.shape == x_ragged.shape
    assert jnp.allclose(out_r, ref_r, atol=1e-4, rtol=1e-4)

    # bf16 path (operands stay bf16, accumulation in f32) — loose tolerance.
    xb = x.astype(jnp.bfloat16)
    w1b, b1b, w2b, b2b = (w1.astype(jnp.bfloat16), b1.astype(jnp.bfloat16),
                          w2.astype(jnp.bfloat16), b2.astype(jnp.bfloat16))
    out_b = jax.block_until_ready(feedforward_geglu(xb, w1b, b1b, w2b, b2b))
    ref_b = _reference(x, w1, b1, w2, b2)
    assert out_b.shape == x.shape
    assert jnp.allclose(out_b.astype(jnp.float32), ref_b, atol=5e-2, rtol=5e-2)

    print("KERNEL_OK")
</pallas_src>

<mosaic_0001>
module attributes {stable_mosaic.version = 11 : i64} {
  func.func @_ffn_geglu_kernel(%arg0: i32, %arg1: i32, %arg2: memref<16x32xf32, #tpu.memory_space<vmem>>, %arg3: memref<32x128xf32, #tpu.memory_space<vmem>>, %arg4: memref<1x128xf32, #tpu.memory_space<vmem>>, %arg5: memref<32x128xf32, #tpu.memory_space<vmem>>, %arg6: memref<1x128xf32, #tpu.memory_space<vmem>>, %arg7: memref<128x32xf32, #tpu.memory_space<vmem>>, %arg8: memref<1x32xf32, #tpu.memory_space<vmem>>, %arg9: memref<16x32xf32, #tpu.memory_space<vmem>>, %arg10: memref<16x32xf32, #tpu.memory_space<vmem>>) attributes {dimension_semantics = [#tpu.dimension_semantics<parallel>, #tpu.dimension_semantics<arbitrary>], iteration_bounds = array<i64: 1, 1>, scalar_prefetch = 0 : i64, scratch_operands = 1 : i64, tpu.core_type = #tpu.core_type<tc>, window_params = [{transform_indices = @transform_0, window_bounds = array<i64: 16, 32>}, {transform_indices = @transform_1, window_bounds = array<i64: 32, 128>}, {transform_indices = @transform_2, window_bounds = array<i64: 1, 128>}, {transform_indices = @transform_3, window_bounds = array<i64: 32, 128>}, {transform_indices = @transform_4, window_bounds = array<i64: 1, 128>}, {transform_indices = @transform_5, window_bounds = array<i64: 128, 32>}, {pipeline_mode = #tpu.pipeline_mode<synchronous>, transform_indices = @transform_6, window_bounds = array<i64: 1, 32>}, {transform_indices = @transform_7, window_bounds = array<i64: 16, 32>}]} {
    %c0_i32 = arith.constant 0 : i32
    %0 = arith.cmpi eq, %arg1, %c0_i32 : i32
    %1 = arith.extui %0 : i1 to i32
    %c0_i32_0 = arith.constant 0 : i32
    %2 = arith.cmpi ne, %1, %c0_i32_0 : i32
    scf.if %2 {
      %cst_23 = arith.constant 0.000000e+00 : f32
      %31 = vector.broadcast %cst_23 : f32 to vector<16x32xf32>
      %c0_24 = arith.constant 0 : index
      %c0_25 = arith.constant 0 : index
      %32 = vector.load %arg10[%c0_24, %c0_25] : memref<16x32xf32, #tpu.memory_space<vmem>>, vector<16x32xf32>
      tpu.vector_store %arg10[%c0_24, %c0_25], %31 {strides = array<i32>} : memref<16x32xf32, #tpu.memory_space<vmem>>, vector<16x32xf32>,
    } else {
    }
    %c0 = arith.constant 0 : index
    %c0_1 = arith.constant 0 : index
    %3 = vector.load %arg2[%c0, %c0_1] : memref<16x32xf32, #tpu.memory_space<vmem>>, vector<16x32xf32>
    %c0_2 = arith.constant 0 : index
    %c0_3 = arith.constant 0 : index
    %4 = vector.load %arg3[%c0_2, %c0_3] : memref<32x128xf32, #tpu.memory_space<vmem>>, vector<32x128xf32>
    %cst = arith.constant dense<0.000000e+00> : vector<16x128xf32>
    %5 = tpu.matmul %3, %4, %cst {dimension_numbers = #tpu.dot_dimension_numbers<[1], [0], [0], [1], [0, 0, 1, 1], [], []>} : vector<16x32xf32>, vector<32x128xf32>, vector<16x128xf32> -> vector<16x128xf32>
    %c0_4 = arith.constant 0 : index
    %c0_5 = arith.constant 0 : index
    %6 = vector.load %arg4[%c0_4, %c0_5] : memref<1x128xf32, #tpu.memory_space<vmem>>, vector<1x128xf32>
    %7 = vector.broadcast %6 : vector<1x128xf32> to vector<16x128xf32>
    %8 = arith.addf %5, %7 : vector<16x128xf32>
    %c0_6 = arith.constant 0 : index
    %c0_7 = arith.constant 0 : index
    %9 = vector.load %arg5[%c0_6, %c0_7] : memref<32x128xf32, #tpu.memory_space<vmem>>, vector<32x128xf32>
    %cst_8 = arith.constant dense<0.000000e+00> : vector<16x128xf32>
    %10 = tpu.matmul %3, %9, %cst_8 {dimension_numbers = #tpu.dot_dimension_numbers<[1], [0], [0], [1], [0, 0, 1, 1], [], []>} : vector<16x32xf32>, vector<32x128xf32>, vector<16x128xf32> -> vector<16x128xf32>
    %c0_9 = arith.constant 0 : index
    %c0_10 = arith.constant 0 : index
    %11 = vector.load %arg6[%c0_9, %c0_10] : memref<1x128xf32, #tpu.memory_space<vmem>>, vector<1x128xf32>
    %12 = vector.broadcast %11 : vector<1x128xf32> to vector<16x128xf32>
    %13 = arith.addf %10, %12 : vector<16x128xf32>
    %cst_11 = arith.constant 5.000000e-01 : f32
    %14 = vector.broadcast %cst_11 : f32 to vector<16x128xf32>
    %15 = arith.mulf %14, %13 : vector<16x128xf32>
    %cst_12 = arith.constant 0.707106769 : f32
    %16 = vector.broadcast %cst_12 : f32 to vector<16x128xf32>
    %17 = arith.mulf %13, %16 : vector<16x128xf32>
    %18 = math.erf %17 : vector<16x128xf32>
    %cst_13 = arith.constant 1.000000e+00 : f32
    %19 = vector.broadcast %cst_13 : f32 to vector<16x128xf32>
    %20 = arith.addf %19, %18 : vector<16x128xf32>
    %21 = arith.mulf %15, %20 : vector<16x128xf32>
    %22 = arith.mulf %8, %21 : vector<16x128xf32>
    %c0_14 = arith.constant 0 : index
    %c0_15 = arith.constant 0 : index
    %23 = vector.load %arg10[%c0_14, %c0_15] : memref<16x32xf32, #tpu.memory_space<vmem>>, vector<16x32xf32>
    %c0_16 = arith.constant 0 : index
    %c0_17 = arith.constant 0 : index
    %24 = vector.load %arg7[%c0_16, %c0_17] : memref<128x32xf32, #tpu.memory_space<vmem>>, vector<128x32xf32>
    %cst_18 = arith.constant dense<0.000000e+00> : vector<16x32xf32>
    %25 = tpu.matmul %22, %24, %cst_18 {dimension_numbers = #tpu.dot_dimension_numbers<[1], [0], [0], [1], [0, 0, 1, 1], [], []>} : vector<16x128xf32>, vector<128x32xf32>, vector<16x32xf32> -> vector<16x32xf32>
    %26 = arith.addf %23, %25 : vector<16x32xf32>
    %c0_19 = arith.constant 0 : index
    %c0_20 = arith.constant 0 : index
    %27 = vector.load %arg10[%c0_19, %c0_20] : memref<16x32xf32, #tpu.memory_space<vmem>>, vector<16x32xf32>
    tpu.vector_store %arg10[%c0_19, %c0_20], %26 {strides = array<i32>} : memref<16x32xf32, #tpu.memory_space<vmem>>, vector<16x32xf32>,
    %c0_i32_21 = arith.constant 0 : i32
    %28 = arith.cmpi eq, %arg1, %c0_i32_21 : i32
    %29 = arith.extui %28 : i1 to i32
    %c0_i32_22 = arith.constant 0 : i32
    %30 = arith.cmpi ne, %29, %c0_i32_22 : i32
    scf.if %30 {
      %c0_23 = arith.constant 0 : index
      %c0_24 = arith.constant 0 : index
      %31 = vector.load %arg10[%c0_23, %c0_24] : memref<16x32xf32, #tpu.memory_space<vmem>>, vector<16x32xf32>
      %c0_25 = arith.constant 0 : index
      %c0_26 = arith.constant 0 : index
      %32 = vector.load %arg8[%c0_25, %c0_26] : memref<1x32xf32, #tpu.memory_space<vmem>>, vector<1x32xf32>
      %33 = vector.broadcast %32 : vector<1x32xf32> to vector<16x32xf32>
      %34 = arith.addf %31, %33 : vector<16x32xf32>
      %c0_27 = arith.constant 0 : index
      %c0_28 = arith.constant 0 : index
      %35 = vector.load %arg9[%c0_27, %c0_28] : memref<16x32xf32, #tpu.memory_space<vmem>>, vector<16x32xf32>
      tpu.vector_store %arg9[%c0_27, %c0_28], %34 {strides = array<i32>} : memref<16x32xf32, #tpu.memory_space<vmem>>, vector<16x32xf32>,
    } else {
    }
    return
  }
  func.func @transform_0(%arg0: i32, %arg1: i32) -> (i32, i32) {
    %c0_i32 = arith.constant 0 : i32
    %c0_i32_0 = arith.constant 0 : i32
    return %arg0, %c0_i32 : i32, i32
  }
  func.func @transform_1(%arg0: i32, %arg1: i32) -> (i32, i32) {
    %c0_i32 = arith.constant 0 : i32
    %c0_i32_0 = arith.constant 0 : i32
    return %c0_i32, %arg1 : i32, i32
  }
  func.func @transform_2(%arg0: i32, %arg1: i32) -> (i32, i32) {
    %c0_i32 = arith.constant 0 : i32
    %c0_i32_0 = arith.constant 0 : i32
    return %c0_i32, %arg1 : i32, i32
  }
  func.func @transform_3(%arg0: i32, %arg1: i32) -> (i32, i32) {
    %c0_i32 = arith.constant 0 : i32
    %c0_i32_0 = arith.constant 0 : i32
    return %c0_i32, %arg1 : i32, i32
  }
  func.func @transform_4(%arg0: i32, %arg1: i32) -> (i32, i32) {
    %c0_i32 = arith.constant 0 : i32
    %c0_i32_0 = arith.constant 0 : i32
    return %c0_i32, %arg1 : i32, i32
  }
  func.func @transform_5(%arg0: i32, %arg1: i32) -> (i32, i32) {
    %c0_i32 = arith.constant 0 : i32
    %c0_i32_0 = arith.constant 0 : i32
    return %arg1, %c0_i32 : i32, i32
  }
  func.func @transform_6(%arg0: i32, %arg1: i32) -> (i32, i32) {
    %c0_i32 = arith.constant 0 : i32
    %c0_i32_0 = arith.constant 0 : i32
    %c0_i32_1 = arith.constant 0 : i32
    return %c0_i32, %c0_i32_0 : i32, i32
  }
  func.func @transform_7(%arg0: i32, %arg1: i32) -> (i32, i32) {
    %c0_i32 = arith.constant 0 : i32
    %c0_i32_0 = arith.constant 0 : i32
    return %arg0, %c0_i32 : i32, i32
  }
}

</mosaic_0001>

<bundles_post_ra>
// kernel: tpu_custom_call.1
= control target key start
LH: loop header
LB: loop body
LE: loop exit
PB: predicated region body
PF: predicated region fallthrough
CT: control target
= control target key end

     0   :  { %s504_s0 = inlined_call_operand.vmem [shape: f32[16,32], index: 0, kind: input, shape index: {}]   ;;  %s505_s1 = inlined_call_operand.vmem [shape: f32[32,128], index: 1, kind: input, shape index: {}]   ;;  %s506_s2 = inlined_call_operand.vmem [shape: f32[1,128], index: 2, kind: input, shape index: {}]   ;;  %s507_s3 = inlined_call_operand.vmem [shape: f32[32,128], index: 3, kind: input, shape index: {}]   ;;  %s508_s4 = inlined_call_operand.vmem [shape: f32[1,128], index: 4, kind: input, shape index: {}]   ;;  %s509_s5 = inlined_call_operand.vmem [shape: f32[128,32], index: 5, kind: input, shape index: {}]   ;;  %s510_s6 = inlined_call_operand.vmem [shape: f32[1,32], index: 6, kind: input, shape index: {}]   ;;  %s511_s7 = inlined_call_operand.hbm [shape: f32[16,32], index: 7, kind: output, shape index: {}]  }
   0x1   :  { %v77_v0 = vld [vmem:[%s507_s3 + $0x18] sm:$0xff]  ;;  %v76_v1 = vld [vmem:[%s507_s3 + $0x10] sm:$0xff]  ;;  %v75_v2 = vld [vmem:[%s507_s3 + $0x8] sm:$0xff] }
   0x2   :  { %94 = vmatpush.msra.mxu1 %v77_v0  ;;  %v39_v3 = vld [vmem:[%s505_s1 + $0x18] sm:$0xff]  ;;  %v38_v4 = vld [vmem:[%s505_s1 + $0x10] sm:$0xff]  ;;  %v74_v5 = vld [vmem:[%s507_s3] sm:$0xff] }
   0x3   :  { %63 = vmatpush.msra.mxu0 %v39_v3  ;;  %v37_v6 = vld [vmem:[%s505_s1 + $0x8] sm:$0xff] }
   0x4   :  { %95 = vmatpush.msra.mxu1 %v76_v1 }
   0x5   :  { %12 = vsyncpa [#allocation4], 0  ;;  %vm31_vm0 = vcmask 261120   ;;  %v34_v7 = vld [vmem:[%s504_s0] sm:$0xff]  ;;  %64 = vmatpush.msra.mxu0 %v38_v4  ;;  %v35_v9 = vld [vmem:[%s504_s0 + $0x8] sm:$0xff]  ;;  %s331_s27 = smov [#allocation3]  }
   0x6   :  { %96 = vmatpush.msra.mxu1 %v75_v2  ;;  %v36_v8 = vld [vmem:[%s505_s1] sm:$0xff]  ;;  %v212_v10 = vld [vmem:[%s509_s5 + $0x78] sm:$0xff]  ;;  %v211_v11 = vld [vmem:[%s509_s5 + $0x70] sm:$0xff]  ;;  %s257_s28 = sshll.u32 %s331_s27, 4  ;;  %s259_s8 = sshll.u32 %s511_s7, 4  ;;  %s258_s28 = int_to_ptr.vmem [resolvable:$true] %s257_s28  ;;  %s260_s8 = int_to_ptr.hbm [resolvable:$true] %s259_s8 }
   0x7   :  { %65 = vmatpush.msra.mxu0 %v37_v6  ;;  %213 = vmatpush.msra.mxu2 %v212_v10  ;;  %v210_v12 = vld [vmem:[%s509_s5 + $0x68] sm:$0xff]  ;;  %v297_v13 = vld [vmem:[%s508_s4] ss:$0 sm:$0xff]  ;;  %v208_v16 = vld [vmem:[%s509_s5 + $0x58] sm:$0xff]  ;;  %v330_v6 = vmov 0.0   ;;  %s333_s4 = smov 8  }
   0x8   :  { %97 = vmatpush.msra.mxu1 %v74_v5  ;;  %277 = vmatpush.msra.mxu3 %v212_v10  ;;  %v209_v14 = vld [vmem:[%s509_s5 + $0x60] sm:$0xff]  ;;  %v207_v18 = vld [vmem:[%s509_s5 + $0x50] sm:$0xff]  ;;  %v206_v20 = vld [vmem:[%s509_s5 + $0x48] sm:$0xff]  ;;  %32 = vst.msk [vmem:[#allocation2] sm:$0xff] %vm31_vm0, %v330_v6 }
   0x9   :  { %273 = vmatmul.msk.f32.vlgmr.msra.gmra.mxu1 %vm31_vm0, %v34_v7  ;;  %66 = vmatpush.msra.mxu0 %v36_v8  ;;  %v205_v22 = vld [vmem:[%s509_s5 + $0x40] sm:$0xff]  ;;  %v204_v23 = vld [vmem:[%s509_s5 + $0x38] sm:$0xff]  ;;  %v203_v26 = vld [vmem:[%s509_s5 + $0x30] sm:$0xff]  ;;  %33 = vst.msk [vmem:[#allocation2 + $0x8] sm:$0xff] %vm31_vm0, %v330_v6 }
   0xa   :  { %271 = vmatmul.msk.f32.vlgmr.msra.gmra.mxu0 %vm31_vm0, %v34_v7  ;;  %214 = vmatpush.msra.mxu2 %v211_v11  ;;  %v202_v30 = vld [vmem:[%s509_s5 + $0x28] sm:$0xff]  ;;  %v201_v33 = vld [vmem:[%s509_s5 + $0x20] sm:$0xff]  ;;  %v200_v37 = vld [vmem:[%s509_s5 + $0x18] sm:$0xff] }
   0xb   :  { %278 = vmatpush.msra.mxu3 %v211_v11  ;;  %v199_v40 = vld [vmem:[%s509_s5 + $0x10] sm:$0xff]  ;;  %v198_v45 = vld [vmem:[%s509_s5 + $0x8] sm:$0xff]  ;;  %v197_v49 = vld [vmem:[%s509_s5] sm:$0xff] }
   0xc   :  { %215 = vmatpush.msra.mxu2 %v210_v12 }
   0xd   :  { %279 = vmatpush.msra.mxu3 %v210_v12 }
   0xe   :  { %216 = vmatpush.msra.mxu2 %v209_v14 }
   0xf   :  { %280 = vmatpush.msra.mxu3 %v209_v14 }
  0x10   :  { %217 = vmatpush.msra.mxu2 %v208_v16 }
  0x11   :  { %274 = vmatmul.msk.f32.gmra.mxu1 %vm31_vm0, %v35_v9  ;;  %281 = vmatpush.msra.mxu3 %v208_v16 }
  0x12   :  { %272 = vmatmul.msk.f32.gmra.mxu0 %vm31_vm0, %v35_v9  ;;  %218 = vmatpush.msra.mxu2 %v207_v18 }
  0x13   :  { %282 = vmatpush.msra.mxu3 %v207_v18 }
  0x14   :  { %219 = vmatpush.msra.mxu2 %v206_v20 }
  0x15   :  { %283 = vmatpush.msra.mxu3 %v206_v20 }
  0x16   :  { %220 = vmatpush.msra.mxu2 %v205_v22 }
  0x17   :  { %284 = vmatpush.msra.mxu3 %v205_v22 }
  0x18   :  { %221 = vmatpush.msra.mxu2 %v204_v23 }
  0x19   :  { %285 = vmatpush.msra.mxu3 %v204_v23 }
  0x1a   :  { %222 = vmatpush.msra.mxu2 %v203_v26 }
  0x1b   :  { %286 = vmatpush.msra.mxu3 %v203_v26 }
  0x1c   :  { %223 = vmatpush.msra.mxu2 %v202_v30 }
  0x1d   :  { %287 = vmatpush.msra.mxu3 %v202_v30 }
  0x1e   :  { %224 = vmatpush.msra.mxu2 %v201_v33 }
  0x1f   :  { %288 = vmatpush.msra.mxu3 %v201_v33 }
  0x20   :  { %225 = vmatpush.msra.mxu2 %v200_v37 }
  0x21   :  { %289 = vmatpush.msra.mxu3 %v200_v37 }
  0x22   :  { %226 = vmatpush.msra.mxu2 %v199_v40 }
  0x23   :  { %290 = vmatpush.msra.mxu3 %v199_v40 }
  0x24   :  { %227 = vmatpush.msra.mxu2 %v198_v45 }
  0x25   :  { %291 = vmatpush.msra.mxu3 %v198_v45 }
  0x26   :  { %228 = vmatpush.msra.mxu2 %v197_v49 }
  0x27   :  { %292 = vmatpush.msra.mxu3 %v197_v49 }
  0x86   :  { %v99_v15 = vpop.f32.mrf.mxu1 }
  0x87   :  { %v426_v17 = vadd.f32 %v297_v13, %v99_v15 }
  0x89   :  { %v432_v19 = vmul.f32 0.70710677, %v426_v17 }
  0x8b   :  { %v109_v21 = vmul.f32 %v432_v19, %v432_v19 }
  0x8d   :  { %v445_v24 = vmin.f32 %v109_v21, 16.0 }
  0x8e   :  { %v102_v25 = vpop.f32.mrf.mxu1 }
  0x8f   :  { %v111_v27 = vmul.f32 2.1237322e-06, %v445_v24  ;;  %v451_v28 = vadd.f32 %v297_v13, %v102_v25  ;;  %v122_v29 = vmul.f32 3.8918573e-05, %v445_v24 }
  0x91   :  { %v112_v31 = vadd.f32 0.00028619796, %v111_v27  ;;  %v458_v32 = vmul.f32 0.70710677, %v451_v28  ;;  %v123_v34 = vadd.f32 0.001143296, %v122_v29  ;;  %v68_v27 = vpop.f32.mrf.mxu0 }
  0x93   :  { %v113_v35 = vmul.f32 %v112_v31, %v445_v24  ;;  %v149_v36 = vmul.f32 %v458_v32, %v458_v32  ;;  %v124_v38 = vmul.f32 %v123_v34, %v445_v24  ;;  %v298_v31 = vld [vmem:[%s506_s2] ss:$0 sm:$0xff] }
  0x94   :  { %v69_v40 = vadd.f32 %v298_v31, %v68_v27 }
  0x95   :  { %v150_v39 = vmin.f32 %v149_v36, 16.0  ;;  %v125_v41 = vadd.f32 0.014752088, %v124_v38  ;;  %v114_v42 = vadd.f32 0.0036580483, %v113_v35 }
  0x97   :  { %v151_v43 = vmul.f32 2.1237322e-06, %v150_v39  ;;  %v162_v44 = vmul.f32 3.8918573e-05, %v150_v39  ;;  %v126_v46 = vmul.f32 %v125_v41, %v445_v24  ;;  %v115_v51 = vmul.f32 %v114_v42, %v445_v24 }
  0x99   :  { %v152_v47 = vadd.f32 0.00028619796, %v151_v43  ;;  %v163_v48 = vadd.f32 0.001143296, %v162_v44  ;;  %v127_v50 = vadd.f32 0.112945676, %v126_v46  ;;  %v71_v49 = vpop.f32.mrf.mxu0 }
  0x9a   :  { %v116_v58 = vadd.f32 0.05243302, %v115_v51  ;;  %v106_v51 = vmul.f32 0.5, %v451_v28 }
  0x9b   :  { %v153_v52 = vmul.f32 %v152_v47, %v150_v39  ;;  %v164_v53 = vmul.f32 %v163_v48, %v150_v39  ;;  %v128_v54 = vmul.f32 %v127_v50, %v445_v24 }
  0x9c   :  { %v117_v0 = vmul.f32 %v116_v58, %v445_v24 }
  0x9d   :  { %v165_v55 = vadd.f32 0.014752088, %v164_v53  ;;  %v154_v56 = vadd.f32 0.0036580483, %v153_v52  ;;  %v129_v57 = vadd.f32 0.4994258, %v128_v54  ;;  %v72_v52 = vadd.f32 %v298_v31, %v71_v49 }
  0x9e   :  { %v118_v4 = vadd.f32 0.18741608, %v117_v0 }
  0x9f   :  { %v166_v59 = vmul.f32 %v165_v55, %v150_v39  ;;  %v130_v60 = vmul.f32 %v129_v57, %v445_v24  ;;  %v155_v62 = vmul.f32 %v154_v56, %v150_v39  ;;  %v195_v55 = vld [vmem:[#allocation2] sm:$0xff] }
  0xa0   :  { %v119_v10 = vmul.f32 %v118_v4, %v445_v24 }
  0xa1   :  { %v167_v61 = vadd.f32 0.112945676, %v166_v59  ;;  %v131_v63 = vadd.f32 1.0, %v130_v60  ;;  %v156_v3 = vadd.f32 0.05243302, %v155_v62 }
  0xa2   :  { %v120_v15 = vadd.f32 1.1283791, %v119_v10  ;;  %v299_v59 = vld [vmem:[%s510_s6] ss:$0 sm:$0xff]  ;;  %s332_s6 = smov 128  }
  0xa3   :  { %v168_v1 = vmul.f32 %v167_v61, %v150_v39  ;;  %300 = vrcp.f32 %v131_v63  ;;  %v157_v9 = vmul.f32 %v156_v3, %v150_v39  ;;  %v143_v14 = vand.u32 2147483648, %v131_v63 }
  0xa4   :  { %v141_v18 = vand.u32 2147483647, %v131_v63  ;;  %vm137_vm2 = vweird.f32 %v131_v63  ;;  %v121_v26 = vmul.f32 %v120_v15, %v432_v19  ;;  %v105_v19 = vmul.f32 0.5, %v426_v17 }
  0xa5   :  { %v169_v2 = vadd.f32 0.4994258, %v168_v1  ;;  %v158_v13 = vadd.f32 0.18741608, %v157_v9  ;;  %v144_v23 = vor.u32 1.1754944e-38, %v143_v14 }
  0xa6   :  { %vm142_vm4 = vcmp.eq.f32.partialorder %v141_v18, 8.507059e+37 }
  0xa7   :  { %v170_v5 = vmul.f32 %v169_v2, %v150_v39  ;;  %v159_v22 = vmul.f32 %v158_v13, %v150_v39 }
  0xa9   :  { %v171_v7 = vadd.f32 1.0, %v170_v5  ;;  %v301_v8 = vpop.eup %300  ;;  %v160_v35 = vadd.f32 1.1283791, %v159_v22 }
  0xaa   :  { %v133_v11 = vmul.f32 %v301_v8, %v131_v63  ;;  %vm138_vm1 = vweird.f32 %v301_v8 }
  0xab   :  { %302 = vrcp.f32 %v171_v7  ;;  %vm139_vm3 = vmor %vm137_vm2, %vm138_vm1  ;;  %v183_v34 = vand.u32 2147483648, %v171_v7  ;;  %v181_v37 = vand.u32 2147483647, %v171_v7  ;;  %vm177_vm6 = vweird.f32 %v171_v7 }
  0xac   :  { %v134_v12 = vsub.f32 1.0, %v133_v11  ;;  %v161_v43 = vmul.f32 %v160_v35, %v458_v32  ;;  %v196_v32 = vld [vmem:[#allocation2 + $0x8] sm:$0xff] }
  0xad   :  { %v184_v42 = vor.u32 1.1754944e-38, %v183_v34  ;;  %vm182_vm8 = vcmp.eq.f32.partialorder %v181_v37, 8.507059e+37 }
  0xae   :  { %v135_v16 = vmul.f32 %v301_v8, %v134_v12 }
  0xb0   :  { %v136_v21 = vadd.f32 %v301_v8, %v135_v16 }
  0xb1   :  { %v303_v20 = vpop.eup %302 }
  0xb2   :  { %v173_v25 = vmul.f32 %v303_v20, %v171_v7  ;;  %v140_v24 = vsel %vm139_vm3, %v301_v8, %v136_v21  ;;  %vm178_vm5 = vweird.f32 %v303_v20 }
  0xb3   :  { %v145_v29 = vsel %vm142_vm4, %v144_v23, %v140_v24  ;;  %vm179_vm7 = vmor %vm177_vm6, %vm178_vm5 }
  0xb4   :  { %v174_v30 = vsub.f32 1.0, %v173_v25  ;;  %v146_v33 = vmul.f32 %v145_v29, %v121_v26 }
  0xb6   :  { %v175_v36 = vmul.f32 %v303_v20, %v174_v30  ;;  %v275_v38 = vclamps-f32 %v146_v33, 1.0 }
  0xb8   :  { %v176_v39 = vadd.f32 %v303_v20, %v175_v36  ;;  %v189_v41 = vadd.f32 1.0, %v275_v38 }
  0xba   :  { %v180_v44 = vsel %vm179_vm7, %v303_v20, %v176_v39  ;;  %v191_v45 = vmul.f32 %v189_v41, %v105_v19 }
  0xbb   :  { %v185_v46 = vsel %vm182_vm8, %v184_v42, %v180_v44 }
  0xbc   :  { %v186_v47 = vmul.f32 %v185_v46, %v161_v43  ;;  %v193_v48 = vmul.f32 %v191_v45, %v69_v40 }
  0xbe   :  { %v276_v50 = vclamps-f32 %v186_v47, 1.0  ;;  %229 = vmatmul.f32.vlgmr.msra.gmra.mxu2 %v193_v48 }
  0xc0   :  { %v190_v53 = vadd.f32 1.0, %v276_v50 }
  0xc2   :  { %v192_v17 = vmul.f32 %v190_v53, %v106_v51 }
  0xc4   :  { %v194_v54 = vmul.f32 %v192_v17, %v72_v52 }
  0xc6   :  { %232 = vmatmul.f32.vlgmr.msra.gmra.mxu3 %v194_v54 }
 0x141   :  { %v230_v56 = vpop.f32.mrf.mxu2 }
 0x142   :  { %v236_v57 = vadd.f32 %v230_v56, %v195_v55 }
 0x144   :  { %238 = vst.msk [vmem:[#allocation2] sm:$0xff] %vm31_vm0, %v236_v57 }
 0x149   :  { %v233_v58 = vpop.f32.mrf.mxu3 }
 0x14a   :  { %v237_v60 = vadd.f32 %v233_v58, %v196_v32 }
 0x14b   :  { %v243_v28 = vld [vmem:[#allocation2] sm:$0xff] }
 0x14c   :  { %239 = vst.msk [vmem:[#allocation2 + $0x8] sm:$0xff] %vm31_vm0, %v237_v60  ;;  %v249_v61 = vadd.f32 %v299_v59, %v243_v28 }
 0x14e   :  { %251 = vst.msk [vmem:[#allocation3] sm:$0xff] %vm31_vm0, %v249_v61 }
 0x153   :  { %v244_v62 = vld [vmem:[#allocation2 + $0x8] sm:$0xff] }
 0x154   :  { %v250_v63 = vadd.f32 %v299_v59, %v244_v62 }
 0x156   :  { %252 = vst.msk [vmem:[#allocation3 + $0x8] sm:$0xff] %vm31_vm0, %v250_v63 }
 0x157   :  { %265 = dma.vmem_to_hbm [thread:$0]  %s258_s28, 256, %s260_s8, [#allocation4], %s332_s6, %s332_s6, %s333_s4  }
 0x158   :  { %328 = dma.done.wait [#allocation4], 256  }
 0x159   :  { %329 = vsyncadd [#allocation4], 4294967040 }
 0x15a   :  { %270 = vsyncpa [#allocation4], 1 }

</bundles_post_ra>
